<compile_context>
chip_gen: v7x
topology: tpu7x:2x2x1
jax: 0.10.0
libtpu: 0.0.40
codegen_flags: <defaults>
</compile_context>

<pallas_src>
import functools
import math

import jax
import jax.numpy as jnp
from jax.experimental import pallas as pl
from jax.experimental.pallas import tpu as pltpu


def _round_up(x, m):
    return ((x + m - 1) // m) * m


def _fused_conv_tanh_kernel(x_ref, w_ref, b_ref, o_ref, xbig_ref, *,
                            b_tile, seq, k_max, band):
    """One grid step: b_tile batch elements, whole sequence.

    x_ref    : (b_tile, seq, E)      bf16  un-padded embedded tokens
    w_ref    : (k_max, E, F_pad)     bf16  fused per-tap-offset weights
    b_ref    : (1, F_pad)            f32   fused bias (zero in padded lanes)
    o_ref    : (b_tile, seq, F_pad)  f32   tanh(conv) output
    xbig_ref : (b_tile*band, E)      bf16  scratch: per-batch zero-haloed bands
    """
    P = k_max // 2
    M = b_tile * band - 2 * P          # rows of the accumulated matmul

    # Build the zero-haloed bands.  Halos are re-zeroed every step (cheap:
    # 2*P rows per batch element) so this is correct even when the parallel
    # batch axis is sharded across TensorCores.
    for b in range(b_tile):
        if P > 0:
            zero_halo = jnp.zeros((P, x_ref.shape[-1]), dtype=xbig_ref.dtype)
            xbig_ref[pl.ds(b * band, P), :] = zero_halo
            xbig_ref[pl.ds(b * band + P + seq, P), :] = zero_halo
        xbig_ref[pl.ds(b * band + P, seq), :] = x_ref[b]

    # Accumulated per-tap dots (no materialized im2col window, no lane
    # concat):  acc[t, :] = sum_d  xbig[t + d, :] @ W_d,   f32 accumulation.
    # Valid output rows of batch b are t in [b*band, b*band + seq); for those
    # rows every read xbig[t + d] stays inside batch b's band (incl. its zero
    # halo), so there is no cross-batch leakage.
    acc = jnp.dot(xbig_ref[pl.ds(0, M), :], w_ref[0],
                  preferred_element_type=jnp.float32)
    for d in range(1, k_max):
        acc = acc + jnp.dot(xbig_ref[pl.ds(d, M), :], w_ref[d],
                            preferred_element_type=jnp.float32)

    z = jnp.tanh(acc + b_ref[...])     # (M, F_pad) f32
    for b in range(b_tile):
        o_ref[b] = z[b * band:b * band + seq, :].astype(o_ref.dtype)


def fuse_conv_params(convs, *, lane_multiple=128):
    """Precompute (once, at init) the fused per-tap-offset weights and bias.

    convs : list of (weight (F, E, k) f32, bias (F,) f32) with odd k.
    Tap j of filter f (half-width p_f = k_f//2) lands at offset
    d = P - p_f + j within [0, k_max); its columns are [f*F, (f+1)*F).
    """
    F, E, _ = convs[0][0].shape
    filter_sizes = [int(w.shape[-1]) for (w, _) in convs]
    for k in filter_sizes:
        # PyTorch Conv1d with even k and padding k//2 emits S+1 positions;
        # the module is used with odd sizes ("3,5,9,...") -- assert instead
        # of silently mismatching.
        assert k % 2 == 1, f"even filter size {k} not supported (S+1 outputs)"
    k_max = max(filter_sizes)
    P = k_max // 2
    F_total = F * len(convs)
    F_pad = _round_up(F_total, lane_multiple)   # lane-dense output stores

    w_taps = jnp.zeros((k_max, E, F_pad), jnp.float32)
    bias = jnp.zeros((F_pad,), jnp.float32)
    for f, (w, b) in enumerate(convs):
        k = int(w.shape[-1])
        p = k // 2
        c0 = f * F
        for j in range(k):
            d = P - p + j
            w_taps = w_taps.at[d, :, c0:c0 + F].set(jnp.transpose(w[:, :, j]))
        bias = bias.at[c0:c0 + F].set(b)

    return dict(w_taps=w_taps.astype(jnp.bfloat16),
                bias=bias.reshape(1, F_pad),
                k_max=k_max, F=F, F_total=F_total, F_pad=F_pad, E=E)


def fused_multiconv_tanh(x_emb, fused, *, b_tile=None, slice_output=True):
    """x_emb (B, S, E) bf16 -> (B, S, F_total) f32 (or (B, S, F_pad) when
    slice_output=False; padded lanes are exactly zero)."""
    B, S, E = x_emb.shape
    assert E == fused['E']
    k_max, F_pad, F_total = fused['k_max'], fused['F_pad'], fused['F_total']
    P = k_max // 2
    band = S + 2 * P                     # per-batch zero-haloed band length

    # Rows per grid step: feed the MXU with >=128 rows when the batch allows.
    # At realistic S (thousands) this is 1 and the "parallel" batch grid axis
    # shards across v7x's two TensorCores.
    if b_tile is None:
        b_tile = max(1, min(B, pl.cdiv(128, S)))
    B_pad = _round_up(B, b_tile)
    if B_pad != B:
        x_emb = jnp.pad(x_emb, ((0, B_pad - B), (0, 0), (0, 0)))
    grid = (B_pad // b_tile,)

    # Explicit VMEM budget (v5e default scoped limit 16 MiB, v7x physical
    # 64 MiB).  Whole-S blocks fit comfortably for this model's shapes.
    # TODO(synk): tile S (with a k_max-1 halo in the index_map) for extremely
    # long sequences.
    x_blk = b_tile * S * E * 2
    w_blk = k_max * E * F_pad * 2
    o_blk = b_tile * S * F_pad * 4
    scratch = b_tile * band * E * 2
    acc = b_tile * band * F_pad * 4
    need = 2 * (x_blk + w_blk + o_blk) + scratch + 3 * acc + (4 << 20)
    vmem_limit = int(min(64 << 20, max(need, 16 << 20)))

    kernel = functools.partial(_fused_conv_tanh_kernel, b_tile=b_tile,
                               seq=S, k_max=k_max, band=band)
    out = pl.pallas_call(
        kernel,
        out_shape=jax.ShapeDtypeStruct((B_pad, S, F_pad), jnp.float32),
        grid_spec=pltpu.PrefetchScalarGridSpec(
            num_scalar_prefetch=0,
            grid=grid,
            in_specs=[
                pl.BlockSpec((b_tile, S, E), lambda i: (i, 0, 0)),
                # Constant-index weight/bias blocks (tiny here).
                # TODO(synk): pipeline_mode=pl.Buffered(1) once k_max*E*F_pad
                # grows enough that a redundant second buffer matters.
                pl.BlockSpec((k_max, E, F_pad), lambda i: (0, 0, 0)),
                pl.BlockSpec((1, F_pad), lambda i: (0, 0)),
            ],
            out_specs=pl.BlockSpec((b_tile, S, F_pad), lambda i: (i, 0, 0)),
            scratch_shapes=[pltpu.VMEM((b_tile * band, E), jnp.bfloat16)],
        ),
        compiler_params=pltpu.CompilerParams(
            dimension_semantics=("parallel",),
            vmem_limit_bytes=vmem_limit),
    )(x_emb, fused['w_taps'], fused['bias'])

    if B_pad != B:
        out = out[:B]
    if slice_output and F_pad != F_total:
        out = out[..., :F_total]
    return out


def init_multicnn_params(key, vocab_size, embed_size, num_filter_maps,
                         filter_sizes):
    """Deterministic parameter init mirroring the module's __init__ shapes."""
    keys = jax.random.split(key, 1 + 2 * len(filter_sizes))
    # nn.Embedding(vocab, embed_size, padding_idx=0): row 0 must be zeros.
    emb = jax.random.normal(keys[0], (vocab_size, embed_size), jnp.float32)
    emb = emb.at[0].set(0.0)
    convs = []
    for i, k in enumerate(filter_sizes):
        # xavier_uniform on Conv1d weight (F, E, K)
        fan_in, fan_out = embed_size * k, num_filter_maps * k
        bound = math.sqrt(6.0 / (fan_in + fan_out))
        w = jax.random.uniform(keys[1 + 2 * i],
                               (num_filter_maps, embed_size, k),
                               jnp.float32, -bound, bound)
        bbound = 1.0 / math.sqrt(fan_in)
        b = jax.random.uniform(keys[2 + 2 * i], (num_filter_maps,),
                               jnp.float32, -bbound, bbound)
        convs.append((w, b))
    return emb, convs


def multicnn_forward(token_ids, emb_table_bf16, fused, **kwargs):
    """token_ids (B, S) int32 -> (B, S, filter_num * F) float32."""
    # Embedding lookup; dropout is identity at inference; use_elmo=False.
    # The table is pre-cast to bf16 so the gather output feeds the kernel
    # directly (no extra pad/cast HBM pass between gather and kernel).
    # TODO(synk): fuse the gather into the kernel (scalar-prefetched token
    # ids + DMA row gather from an HBM-resident table) to drop the (B,S,E)
    # HBM round-trip entirely.
    x_emb = jnp.take(emb_table_bf16, token_ids, axis=0)   # (B, S, E) bf16
    return fused_multiconv_tanh(x_emb, fused, **kwargs)


def _reference_forward(token_ids, emb_table_bf16, convs):
    """Pure-JAX reference matching PyTorch Conv1d semantics (NCW), using the
    same bf16 inputs / f32 accumulation as the kernel so the comparison
    isolates structural correctness."""
    x_emb = jnp.take(emb_table_bf16, token_ids, axis=0)
    x_ncw = jnp.transpose(x_emb, (0, 2, 1))               # (B, E, S)
    outs = []
    for w, b in convs:
        K = w.shape[-1]
        y = jax.lax.conv_general_dilated(
            x_ncw, w.astype(jnp.bfloat16),
            window_strides=(1,), padding=[(K // 2, K // 2)],
            dimension_numbers=('NCH', 'OIH', 'NCH'),
            preferred_element_type=jnp.float32)
        y = jnp.tanh(y + b[None, :, None])
        outs.append(jnp.transpose(y, (0, 2, 1)))
    return jnp.concatenate(outs, axis=-1)


if __name__ == "__main__":
    # Small shapes consistent with the module:
    # batch=2, seq=16, vocab=20, embed_size(feature_size)=32,
    # num_filter_maps=32, filter_size="3,5" (filter_num=2).
    B, S, VOCAB, E, F = 2, 16, 20, 32, 32
    FILTER_SIZES = (3, 5)

    key = jax.random.PRNGKey(0)
    k_tok, k_param = jax.random.split(key)
    token_ids = jax.random.randint(k_tok, (B, S), 0, VOCAB, dtype=jnp.int32)
    emb_table, convs = init_multicnn_params(k_param, VOCAB, E, F, FILTER_SIZES)

    # One-time (init-path) preprocessing, hoisted out of the forward pass:
    emb_table_bf16 = emb_table.astype(jnp.bfloat16)        # row 0 stays zero
    fused = fuse_conv_params(convs)

    out = multicnn_forward(token_ids, emb_table_bf16, fused)
    out = jax.block_until_ready(out)

    ref = _reference_forward(token_ids, emb_table_bf16, convs)
    assert out.shape == (B, S, len(FILTER_SIZES) * F), out.shape
    # bf16 MXU inputs / f32 accumulation is a deliberate deviation from the
    # f32 PyTorch model; tolerance documents it (reference uses same dtypes).
    assert jnp.allclose(out, ref, atol=5e-3, rtol=5e-3), "mismatch vs reference"

    # TODO(synk): use_elmo / pretrained-embedding (.bin) file loading paths
    # are data-loading glue, not kernel compute; omitted (use_elmo=False).
    print("KERNEL_OK")
</pallas_src>

<mosaic_0001>
module attributes {stable_mosaic.version = 11 : i64} {
  func.func @_fused_conv_tanh_kernel(%arg0: i32, %arg1: memref<2x16x32xbf16, #tpu.memory_space<vmem>>, %arg2: memref<5x32x128xbf16, #tpu.memory_space<vmem>>, %arg3: memref<1x128xf32, #tpu.memory_space<vmem>>, %arg4: memref<2x16x128xf32, #tpu.memory_space<vmem>>, %arg5: memref<40x32xbf16, #tpu.memory_space<vmem>>) attributes {dimension_semantics = [#tpu.dimension_semantics<parallel>], iteration_bounds = array<i64: 1>, scalar_prefetch = 0 : i64, scratch_operands = 1 : i64, tpu.core_type = #tpu.core_type<tc>, window_params = [{transform_indices = @transform_0, window_bounds = array<i64: 2, 16, 32>}, {pipeline_mode = #tpu.pipeline_mode<synchronous>, transform_indices = @transform_1, window_bounds = array<i64: 5, 32, 128>}, {pipeline_mode = #tpu.pipeline_mode<synchronous>, transform_indices = @transform_2, window_bounds = array<i64: 1, 128>}, {transform_indices = @transform_3, window_bounds = array<i64: 2, 16, 128>}]} {
    %cst = arith.constant 0.000000e+00 : bf16
    %0 = vector.broadcast %cst : bf16 to vector<2x32xbf16>
    %c0 = arith.constant 0 : index
    %c0_0 = arith.constant 0 : index
    %1 = vector.load %arg5[%c0, %c0_0] : memref<40x32xbf16, #tpu.memory_space<vmem>>, vector<2x32xbf16>
    tpu.vector_store %arg5[%c0, %c0_0], %0 {strides = array<i32>} : memref<40x32xbf16, #tpu.memory_space<vmem>>, vector<2x32xbf16>,
    %c18 = arith.constant 18 : index
    %c0_1 = arith.constant 0 : index
    %2 = vector.load %arg5[%c18, %c0_1] : memref<40x32xbf16, #tpu.memory_space<vmem>>, vector<2x32xbf16>
    tpu.vector_store %arg5[%c18, %c0_1], %0 {strides = array<i32>} : memref<40x32xbf16, #tpu.memory_space<vmem>>, vector<2x32xbf16>,
    %c0_2 = arith.constant 0 : index
    %c0_3 = arith.constant 0 : index
    %c0_4 = arith.constant 0 : index
    %3 = vector.load %arg1[%c0_2, %c0_3, %c0_4] : memref<2x16x32xbf16, #tpu.memory_space<vmem>>, vector<1x16x32xbf16>
    %4 = vector.shape_cast %3 : vector<1x16x32xbf16> to vector<16x32xbf16>
    %c2 = arith.constant 2 : index
    %c0_5 = arith.constant 0 : index
    %5 = vector.load %arg5[%c2, %c0_5] : memref<40x32xbf16, #tpu.memory_space<vmem>>, vector<16x32xbf16>
    tpu.vector_store %arg5[%c2, %c0_5], %4 {strides = array<i32>} : memref<40x32xbf16, #tpu.memory_space<vmem>>, vector<16x32xbf16>,
    %cst_6 = arith.constant 0.000000e+00 : bf16
    %6 = vector.broadcast %cst_6 : bf16 to vector<2x32xbf16>
    %c20 = arith.constant 20 : index
    %c0_7 = arith.constant 0 : index
    %7 = vector.load %arg5[%c20, %c0_7] : memref<40x32xbf16, #tpu.memory_space<vmem>>, vector<2x32xbf16>
    tpu.vector_store %arg5[%c20, %c0_7], %6 {strides = array<i32>} : memref<40x32xbf16, #tpu.memory_space<vmem>>, vector<2x32xbf16>,
    %c38 = arith.constant 38 : index
    %c0_8 = arith.constant 0 : index
    %8 = vector.load %arg5[%c38, %c0_8] : memref<40x32xbf16, #tpu.memory_space<vmem>>, vector<2x32xbf16>
    tpu.vector_store %arg5[%c38, %c0_8], %6 {strides = array<i32>} : memref<40x32xbf16, #tpu.memory_space<vmem>>, vector<2x32xbf16>,
    %c1 = arith.constant 1 : index
    %c0_9 = arith.constant 0 : index
    %c0_10 = arith.constant 0 : index
    %9 = vector.load %arg1[%c1, %c0_9, %c0_10] : memref<2x16x32xbf16, #tpu.memory_space<vmem>>, vector<1x16x32xbf16>
    %10 = vector.shape_cast %9 : vector<1x16x32xbf16> to vector<16x32xbf16>
    %c22 = arith.constant 22 : index
    %c0_11 = arith.constant 0 : index
    %11 = vector.load %arg5[%c22, %c0_11] : memref<40x32xbf16, #tpu.memory_space<vmem>>, vector<16x32xbf16>
    tpu.vector_store %arg5[%c22, %c0_11], %10 {strides = array<i32>} : memref<40x32xbf16, #tpu.memory_space<vmem>>, vector<16x32xbf16>,
    %c0_12 = arith.constant 0 : index
    %c0_13 = arith.constant 0 : index
    %12 = vector.load %arg5[%c0_12, %c0_13] : memref<40x32xbf16, #tpu.memory_space<vmem>>, vector<36x32xbf16>
    %c0_14 = arith.constant 0 : index
    %c0_15 = arith.constant 0 : index
    %c0_16 = arith.constant 0 : index
    %13 = vector.load %arg2[%c0_14, %c0_15, %c0_16] : memref<5x32x128xbf16, #tpu.memory_space<vmem>>, vector<1x32x128xbf16>
    %14 = vector.shape_cast %13 : vector<1x32x128xbf16> to vector<32x128xbf16>
    %cst_17 = arith.constant dense<0.000000e+00> : vector<36x128xf32>
    %15 = tpu.matmul %12, %14, %cst_17 {dimension_numbers = #tpu.dot_dimension_numbers<[1], [0], [0], [1], [0, 0, 1, 1], [], []>} : vector<36x32xbf16>, vector<32x128xbf16>, vector<36x128xf32> -> vector<36x128xf32>
    %c1_18 = arith.constant 1 : index
    %c0_19 = arith.constant 0 : index
    %16 = vector.load %arg5[%c1_18, %c0_19] : memref<40x32xbf16, #tpu.memory_space<vmem>>, vector<36x32xbf16>
    %c1_20 = arith.constant 1 : index
    %c0_21 = arith.constant 0 : index
    %c0_22 = arith.constant 0 : index
    %17 = vector.load %arg2[%c1_20, %c0_21, %c0_22] : memref<5x32x128xbf16, #tpu.memory_space<vmem>>, vector<1x32x128xbf16>
    %18 = vector.shape_cast %17 : vector<1x32x128xbf16> to vector<32x128xbf16>
    %cst_23 = arith.constant dense<0.000000e+00> : vector<36x128xf32>
    %19 = tpu.matmul %16, %18, %cst_23 {dimension_numbers = #tpu.dot_dimension_numbers<[1], [0], [0], [1], [0, 0, 1, 1], [], []>} : vector<36x32xbf16>, vector<32x128xbf16>, vector<36x128xf32> -> vector<36x128xf32>
    %20 = arith.addf %15, %19 : vector<36x128xf32>
    %c2_24 = arith.constant 2 : index
    %c0_25 = arith.constant 0 : index
    %21 = vector.load %arg5[%c2_24, %c0_25] : memref<40x32xbf16, #tpu.memory_space<vmem>>, vector<36x32xbf16>
    %c2_26 = arith.constant 2 : index
    %c0_27 = arith.constant 0 : index
    %c0_28 = arith.constant 0 : index
    %22 = vector.load %arg2[%c2_26, %c0_27, %c0_28] : memref<5x32x128xbf16, #tpu.memory_space<vmem>>, vector<1x32x128xbf16>
    %23 = vector.shape_cast %22 : vector<1x32x128xbf16> to vector<32x128xbf16>
    %cst_29 = arith.constant dense<0.000000e+00> : vector<36x128xf32>
    %24 = tpu.matmul %21, %23, %cst_29 {dimension_numbers = #tpu.dot_dimension_numbers<[1], [0], [0], [1], [0, 0, 1, 1], [], []>} : vector<36x32xbf16>, vector<32x128xbf16>, vector<36x128xf32> -> vector<36x128xf32>
    %25 = arith.addf %20, %24 : vector<36x128xf32>
    %c3 = arith.constant 3 : index
    %c0_30 = arith.constant 0 : index
    %26 = vector.load %arg5[%c3, %c0_30] : memref<40x32xbf16, #tpu.memory_space<vmem>>, vector<36x32xbf16>
    %c3_31 = arith.constant 3 : index
    %c0_32 = arith.constant 0 : index
    %c0_33 = arith.constant 0 : index
    %27 = vector.load %arg2[%c3_31, %c0_32, %c0_33] : memref<5x32x128xbf16, #tpu.memory_space<vmem>>, vector<1x32x128xbf16>
    %28 = vector.shape_cast %27 : vector<1x32x128xbf16> to vector<32x128xbf16>
    %cst_34 = arith.constant dense<0.000000e+00> : vector<36x128xf32>
    %29 = tpu.matmul %26, %28, %cst_34 {dimension_numbers = #tpu.dot_dimension_numbers<[1], [0], [0], [1], [0, 0, 1, 1], [], []>} : vector<36x32xbf16>, vector<32x128xbf16>, vector<36x128xf32> -> vector<36x128xf32>
    %30 = arith.addf %25, %29 : vector<36x128xf32>
    %c4 = arith.constant 4 : index
    %c0_35 = arith.constant 0 : index
    %31 = vector.load %arg5[%c4, %c0_35] : memref<40x32xbf16, #tpu.memory_space<vmem>>, vector<36x32xbf16>
    %c4_36 = arith.constant 4 : index
    %c0_37 = arith.constant 0 : index
    %c0_38 = arith.constant 0 : index
    %32 = vector.load %arg2[%c4_36, %c0_37, %c0_38] : memref<5x32x128xbf16, #tpu.memory_space<vmem>>, vector<1x32x128xbf16>
    %33 = vector.shape_cast %32 : vector<1x32x128xbf16> to vector<32x128xbf16>
    %cst_39 = arith.constant dense<0.000000e+00> : vector<36x128xf32>
    %34 = tpu.matmul %31, %33, %cst_39 {dimension_numbers = #tpu.dot_dimension_numbers<[1], [0], [0], [1], [0, 0, 1, 1], [], []>} : vector<36x32xbf16>, vector<32x128xbf16>, vector<36x128xf32> -> vector<36x128xf32>
    %35 = arith.addf %30, %34 : vector<36x128xf32>
    %c0_40 = arith.constant 0 : index
    %c0_41 = arith.constant 0 : index
    %36 = vector.load %arg3[%c0_40, %c0_41] : memref<1x128xf32, #tpu.memory_space<vmem>>, vector<1x128xf32>
    %37 = vector.broadcast %36 : vector<1x128xf32> to vector<36x128xf32>
    %38 = arith.addf %35, %37 : vector<36x128xf32>
    %39 = math.tanh %38 : vector<36x128xf32>
    %40 = vector.extract_strided_slice %39 {offsets = [0, 0], sizes = [16, 128], strides = [1, 1]} : vector<36x128xf32> to vector<16x128xf32>
    %c0_42 = arith.constant 0 : index
    %c0_43 = arith.constant 0 : index
    %c0_44 = arith.constant 0 : index
    %41 = vector.load %arg4[%c0_42, %c0_43, %c0_44] : memref<2x16x128xf32, #tpu.memory_space<vmem>>, vector<1x16x128xf32>
    %42 = vector.shape_cast %41 : vector<1x16x128xf32> to vector<16x128xf32>
    %43 = vector.shape_cast %40 : vector<16x128xf32> to vector<1x16x128xf32>
    tpu.vector_store %arg4[%c0_42, %c0_43, %c0_44], %43 {strides = array<i32>} : memref<2x16x128xf32, #tpu.memory_space<vmem>>, vector<1x16x128xf32>,
    %44 = vector.extract_strided_slice %39 {offsets = [20, 0], sizes = [16, 128], strides = [1, 1]} : vector<36x128xf32> to vector<16x128xf32>
    %c1_45 = arith.constant 1 : index
    %c0_46 = arith.constant 0 : index
    %c0_47 = arith.constant 0 : index
    %45 = vector.load %arg4[%c1_45, %c0_46, %c0_47] : memref<2x16x128xf32, #tpu.memory_space<vmem>>, vector<1x16x128xf32>
    %46 = vector.shape_cast %45 : vector<1x16x128xf32> to vector<16x128xf32>
    %47 = vector.shape_cast %44 : vector<16x128xf32> to vector<1x16x128xf32>
    tpu.vector_store %arg4[%c1_45, %c0_46, %c0_47], %47 {strides = array<i32>} : memref<2x16x128xf32, #tpu.memory_space<vmem>>, vector<1x16x128xf32>,
    return
  }
  func.func @transform_0(%arg0: i32) -> (i32, i32, i32) {
    %c0_i32 = arith.constant 0 : i32
    %c0_i32_0 = arith.constant 0 : i32
    %c0_i32_1 = arith.constant 0 : i32
    return %arg0, %c0_i32, %c0_i32_0 : i32, i32, i32
  }
  func.func @transform_1(%arg0: i32) -> (i32, i32, i32) {
    %c0_i32 = arith.constant 0 : i32
    %c0_i32_0 = arith.constant 0 : i32
    %c0_i32_1 = arith.constant 0 : i32
    %c0_i32_2 = arith.constant 0 : i32
    return %c0_i32, %c0_i32_0, %c0_i32_1 : i32, i32, i32
  }
  func.func @transform_2(%arg0: i32) -> (i32, i32) {
    %c0_i32 = arith.constant 0 : i32
    %c0_i32_0 = arith.constant 0 : i32
    %c0_i32_1 = arith.constant 0 : i32
    return %c0_i32, %c0_i32_0 : i32, i32
  }
  func.func @transform_3(%arg0: i32) -> (i32, i32, i32) {
    %c0_i32 = arith.constant 0 : i32
    %c0_i32_0 = arith.constant 0 : i32
    %c0_i32_1 = arith.constant 0 : i32
    return %arg0, %c0_i32, %c0_i32_0 : i32, i32, i32
  }
}

</mosaic_0001>

<bundles_post_ra>
// kernel: tpu_custom_call.1
= control target key start
LH: loop header
LB: loop body
LE: loop exit
PB: predicated region body
PF: predicated region fallthrough
CT: control target
= control target key end

     0   :  { %8 = vsyncpa [#allocation4], 0  ;;  %s1070_s0 = inlined_call_operand.hbm [shape: bf16[2,16,32], index: 0, kind: input, shape index: {}]   ;;  %s1071_s1 = inlined_call_operand.hbm [shape: bf16[5,32,128], index: 1, kind: input, shape index: {}]   ;;  %s1072_s2 = inlined_call_operand.vmem [shape: f32[1,128], index: 2, kind: input, shape index: {}]   ;;  %s1073_s3 = inlined_call_operand.hbm [shape: f32[2,16,128], index: 3, kind: output, shape index: {}]  }
   0x1   :  { %9 = vsyncpa [#allocation7], 0 }
   0x2   :  { %10 = vsyncpa [#allocation5], 0  ;;  %s899_s12 = smov [#allocation3]   ;;  %s827_s16 = scalar_lea.hbm %s1070_s0, 256 }
   0x3   :  { %s16_s13 = sshll.u32 %s899_s12, 4  ;;  %p828_p0 = scmp.ne.s32.totalorder %s1070_s0, %s827_s16  ;;  %s17_s13 = int_to_ptr.vmem [resolvable:$true] %s16_s13 }
   0x4   :  { %p831_p1 = scmp.lt.u32.totalorder %s827_s16, %s1070_s0 }
   0x6   :  { %p833_p2 = pnand %p831_p1, %p828_p0 }
   0x8   :  { %836 = shalt.err (!%p833_p2)
}
   0x9   :  { %s837_s21 = scalar_lea.vmem %s17_s13, 256  ;;  %p842_p4 = scmp.lt.s32.totalorder %s17_s13, %s17_s13 }
   0xa   :  { %p838_p3 = scmp.ne.s32.totalorder %s17_s13, %s837_s21  ;;  %p843_p5 = scmp.lt.s32.totalorder %s837_s21, %s837_s21 }
   0xc   :  { %p844_p6 = por %p843_p5, %p842_p4 }
   0xe   :  { %p845_p7 = pnand %p844_p6, %p838_p3 }
  0x10   :  { %848 = shalt.err (!%p845_p7)
}
  0x11   :  { %s900_s22 = smov 64   ;;  %s901_s23 = smov 4  }
  0x12   :  { %22 = dma.hbm_to_vmem [thread:$0]  %s1070_s0, 256, %s17_s13, [#allocation4], %s900_s22, %s900_s22, %s901_s23  }
  0x13   :  { %s902_s26 = smov [#allocation6]   ;;  %s849_s30 = scalar_lea.hbm %s1071_s1, 1280 }
  0x14   :  { %s28_s27 = sshll.u32 %s902_s26, 4  ;;  %p850_p8 = scmp.ne.s32.totalorder %s1071_s1, %s849_s30  ;;  %s29_s27 = int_to_ptr.vmem [resolvable:$true] %s28_s27 }
  0x15   :  { %p853_p9 = scmp.lt.u32.totalorder %s849_s30, %s1071_s1 }
  0x17   :  { %p855_p10 = pnand %p853_p9, %p850_p8 }
  0x19   :  { %858 = shalt.err (!%p855_p10)
}
  0x1a   :  { %s859_s8 = scalar_lea.vmem %s29_s27, 1280  ;;  %p864_p12 = scmp.lt.s32.totalorder %s29_s27, %s29_s27 }
  0x1b   :  { %p860_p11 = scmp.ne.s32.totalorder %s29_s27, %s859_s8  ;;  %p865_p13 = scmp.lt.s32.totalorder %s859_s8, %s859_s8 }
  0x1d   :  { %p866_p0 = por %p865_p13, %p864_p12 }
  0x1f   :  { %p867_p1 = pnand %p866_p0, %p860_p11 }
  0x21   :  { %870 = shalt.err (!%p867_p1)
}
  0x22   :  { %34 = dma.hbm_to_vmem [thread:$0]  %s1071_s1, 1280, %s29_s27, [#allocation7], %s900_s22, %s900_s22, %s901_s23  }
  0x23   :  { %893 = dma.done.wait [#allocation4], 256  }
  0x24   :  { %894 = vsyncadd [#allocation4], 4294967040 }
  0x25   :  { %895 = dma.done.wait [#allocation7], 1280  }
  0x26   :  { %896 = vsyncadd [#allocation7], 4294966016  ;;  %vm44_vm0 = vcmask 253952   ;;  %v903_v0 = vmov 0.0   ;;  %vm46_vm1 = vcmask 254977   ;;  %vm68_vm2 = vcmask 256002  }
  0x27   :  { %786 = vmatprep.subr.bf16.mxu1 %v903_v0  ;;  %706 = vmatprep.subr.bf16.mxu0 %v903_v0  ;;  %vm70_vm3 = vcmask 257027   ;;  %v904_v1 = vmov 0   ;;  %vm905_vm4 = vmmov 0   ;;  %vm65_vm5 = vcmask 257024   ;;  %v800_v2 = vld [vmem:[#allocation6 + $0x10] sm:$0xff]   ;;  %v801_v3 = vld [vmem:[#allocation6 + $0x18] sm:$0xff]  }
  0x28   :  { %45 = vst.msk [vmem:[#allocation2] sm:$0x1] %vm44_vm0, %v904_v1  ;;  %714 = vmatprep.mubr.msk.bf16.mxu1 %vm905_vm4, %v903_v0  ;;  %710 = vmatprep.mubr.msk.bf16.mxu0 %vm905_vm4, %v903_v0  ;;  %vm77_vm6 = vcmask 1042432   ;;  %vm78_vm7 = vcmask 1046532   ;;  %vm90_vm8 = vcmask 256000   ;;  %vm52_vm9 = vcmask 1040384  }
  0x29   :  { %47 = vst.msk [vmem:[#allocation2 + $0x8] sm:$0x2] %vm46_vm1, %v904_v1  ;;  %vm53_vm10 = vcmask 1044484   ;;  %788 = vmatpush3.bf16.msra.mxu1 %v800_v2  ;;  %707 = vmatpush3.bf16.msra.mxu0 %v800_v2  ;;  %v49_v4 = vld [vmem:[#allocation3 + $0x4] sm:$0xf]  ;;  %vm961_vm11 = vmor %vm77_vm6, %vm78_vm7  ;;  %vm63_vm12 = vcmask 257025  }
  0x2a   :  { %69 = vst.msk [vmem:[#allocation2 + $0x8] sm:$0x4] %vm68_vm2, %v904_v1  ;;  %v73_v5 = vld [vmem:[#allocation3 + $0x8] sm:$0xf]  ;;  %v74_v6 = vld [vmem:[#allocation3 + $0xc] sm:$0xf]  ;;  %787 = vmatprep.subr.bf16.mxu1 %v903_v0  ;;  %708 = vmatprep.subr.bf16.mxu0 %v903_v0  ;;  %vm54_vm13 = vmor %vm52_vm9, %vm53_vm10 }
  0x2b   :  { %v57_v7 = vrot.slane %v49_v4, 7  ;;  %v80_v9 = vrot.slane %v73_v5, 5  ;;  %v82_v10 = vrot.slane %v74_v6, 5  ;;  %v48_v11 = vld [vmem:[#allocation3] sm:$0xf]  ;;  %vm156_vm15 = vcmask 261120  }
  0x2c   :  { %v55_v15 = vrot.slane %v48_v11, 7  ;;  %vm120_vm14 = vsmask.f32 7424  ;;  %v804_v32 = vld [vmem:[#allocation6] sm:$0xff]   ;;  %v806_v40 = vld [vmem:[#allocation6 + $0x8] sm:$0xff]   ;;  %v810_v50 = vld [vmem:[#allocation6 + $0x30] sm:$0xff]  }
  0x2d   :  { %v59_v12 = vrot.slane %v57_v7, 4  ;;  %v81_v13 = vrot.slane %v80_v9, 4  ;;  %v84_v14 = vrot.slane %v82_v10, 4  ;;  %88 = vst.msk [vmem:[#allocation2 + $0x8] sm:$0x8] %vm70_vm3, %v80_v9  ;;  %789 = vmatpush3.bf16.msra.mxu1 %v801_v3  ;;  %709 = vmatpush3.bf16.msra.mxu0 %v801_v3  ;;  %v807_v38 = vld [vmem:[#allocation6 + $0x20] sm:$0xff]  }
  0x2e   :  { %722 = vmatprep.subr.bf16.mxu1 %v903_v0  ;;  %v56_v17 = vrot.slane %v55_v15, 4  ;;  %64 = vst.msk [vmem:[#allocation2] sm:$0xe] %vm63_vm12, %v55_v15  ;;  %738 = vmatprep.subr.bf16.mxu0 %v903_v0  ;;  %v808_v43 = vld [vmem:[#allocation6 + $0x28] sm:$0xff]   ;;  %v811_v47 = vld [vmem:[#allocation6 + $0x40] sm:$0xff]   ;;  %v812_v52 = vld [vmem:[#allocation6 + $0x38] sm:$0xff]  }
  0x2f   :  { %67 = vst.msk [vmem:[#allocation2 + $0x8] sm:$0x1] %vm44_vm0, %v59_v12  ;;  %v83_v16 = vsel %vm961_vm11, %v81_v13, %v82_v10  ;;  %vm309_vm0 = vcmask 1046528   ;;  %v813_v49 = vld [vmem:[#allocation6 + $0x48] sm:$0xff]   ;;  %vm519_vm1 = vcmask 1045504  }
  0x30   :  { %91 = vst.msk [vmem:[#allocation2 + $0x10] sm:$0x7] %vm90_vm8, %v84_v14  ;;  %v58_v18 = vsel %vm54_vm13, %v56_v17, %v57_v7  ;;  %vm406_vm2 = vsmask.f32 6400 }
  0x31   :  { %89 = vst.msk [vmem:[#allocation2 + $0xc] sm:$0xf] %vm65_vm5, %v83_v16  ;;  %66 = vst.msk [vmem:[#allocation2 + $0x4] sm:$0xf] %vm65_vm5, %v58_v18 }
  0x35   :  { %v92_v19 = vld [vmem:[#allocation2] sm:$0xf] }
  0x36   :  { %v300_v33 = vld [vmem:[#allocation2] sm:$0xe] }
  0x37   :  { %v979_v21 = vld [vmem:[#allocation2 + $0x10] ss:$0 sps:$4 sm:$0x77]   ;;  %v510_v53 = vld [vmem:[#allocation2] sm:$0xc] }
  0x38   :  { %v977_v20 = vld [vmem:[#allocation2 + $0x8] sm:$0xff]   ;;  %v137_v24 = vshll.u32 %v979_v21, 16  ;;  %v984_v25 = vld [vmem:[#allocation2 + $0x4] sm:$0xf]  ;;  %v141_v37 = vshrl.u32 %v979_v21, 16  ;;  %v313_v48 = vrot.slane %v979_v21, 1 }
  0x39   :  { %v129_v22 = vshll.u32 %v977_v20, 16  ;;  %v133_v23 = vshrl.u32 %v977_v20, 16  ;;  %v648_v26 = vcombine.low %v92_v19, %v984_v25  ;;  %v662_v39 = vcombine.low %v300_v33, %v984_v25  ;;  %v814_v57 = vld [vmem:[#allocation2 + $0x10] ss:$0 sps:$4 sm:$0x33]  }
  0x3a   :  { %v139_v28 = vrot.slane %v137_v24, 1  ;;  %v311_v45 = vrot.slane %v977_v20, 1  ;;  %v674_v54 = vcombine.low %v510_v53, %v984_v25  ;;  %v521_v59 = vrot.slane %v977_v20, 2  ;;  %v816_v1 = vld [vmem:[#allocation2 + $0x10] ss:$0 sps:$4 sm:$0xff]  }
  0x3b   :  { %v131_v27 = vrot.slane %v129_v22, 1  ;;  %v122_v29 = vshrl.u32 %v648_v26, 16  ;;  %v124_v30 = vshll.u32 %v648_v26, 16  ;;  %v310_v44 = vrot.slane %v662_v39, 1 }
  0x3c   :  { %v143_v42 = vor.u32 %v141_v37, %v139_v28  ;;  %v314_v51 = vsel %vm309_vm0, %v311_v45, %v313_v48  ;;  %v408_v55 = vshrl.u32 %v662_v39, 16  ;;  %v411_v56 = vshll.u32 %v662_v39, 16 }
  0x3d   :  { %v135_v31 = vor.u32 %v133_v23, %v131_v27  ;;  %v126_v34 = vrot.slane %v124_v30, 1  ;;  %v312_v46 = vsel %vm309_vm0, %v310_v44, %v311_v45  ;;  %v520_v58 = vrot.slane %v674_v54, 2 }
  0x3e   :  { %v415_v60 = vrot.slane %v133_v23, 1  ;;  %v416_v61 = vrot.slane %v129_v22, 2  ;;  %v410_v62 = vrot.slane %v408_v55, 1  ;;  %v413_v63 = vrot.slane %v411_v56, 2 }
  0x3f   :  { %v140_v35 = vsel %vm120_vm14, %v135_v31, %v139_v28  ;;  %v127_v36 = vor.u32 %v126_v34, %v122_v29  ;;  %v522_v2 = vsel %vm519_vm1, %v520_v58, %v521_v59  ;;  %v420_v5 = vshrl.u32 %v816_v1, 16 }
  0x40   :  { %715 = vmatmul.mubr.msk.bf16.vlgmr.msra.gmra.mrb[0].mxu1 %vm156_vm15, %v140_v35  ;;  %v414_v3 = vor.u32 %v413_v63, %v410_v62  ;;  %v417_v4 = vor.u32 %v416_v61, %v415_v60  ;;  %v423_v6 = vshll.u32 %v816_v1, 16  ;;  %v523_v7 = vrot.slane %v816_v1, 2 }
  0x41   :  { %723 = vmatpush3.bf16.msra.mxu1 %v804_v32  ;;  %718 = vmatprep.mubr.msk.bf16.mxu1 %vm905_vm4, %v903_v0  ;;  %v132_v41 = vsel %vm120_vm14, %v127_v36, %v131_v27  ;;  %v422_v9 = vrot.slane %v420_v5, 1 }
  0x42   :  { %724 = vmatprep.subr.bf16.mxu1 %v903_v0  ;;  %711 = vmatmul.mubr.msk.bf16.vlgmr.msra.gmra.mrb[0].mxu0 %vm156_vm15, %v132_v41  ;;  %v418_v8 = vsel %vm406_vm2, %v414_v3, %v417_v4  ;;  %v425_v10 = vrot.slane %v423_v6, 2  ;;  %v524_v11 = vsel %vm519_vm1, %v521_v59, %v523_v7  ;;  %v680_v3 = vld [vmem:[%s1072_s2] ss:$0 sm:$0xff]  ;;  %s906_s2 = smov [#allocation8]  }
  0x43   :  { %739 = vmatpush3.bf16.msra.mxu0 %v807_v38  ;;  %742 = vmatprep.mubr.msk.bf16.mxu0 %vm905_vm4, %v903_v0  ;;  %s635_s11 = sshll.u32 %s906_s2, 4  ;;  %s636_s11 = int_to_ptr.vmem [resolvable:$true] %s635_s11 }
  0x44   :  { %740 = vmatprep.subr.bf16.mxu0 %v903_v0  ;;  %v426_v12 = vor.u32 %v425_v10, %v422_v9  ;;  %s871_s12 = scalar_lea.vmem %s636_s11, 512  ;;  %p876_p3 = scmp.lt.s32.totalorder %s636_s11, %s636_s11 }
  0x45   :  { %725 = vmatpush3.bf16.msra.mxu1 %v806_v40  ;;  %p872_p2 = scmp.ne.s32.totalorder %s636_s11, %s871_s12  ;;  %p877_p4 = scmp.lt.s32.totalorder %s871_s12, %s871_s12 }
  0x46   :  { %754 = vmatprep.subr.bf16.mxu1 %v903_v0  ;;  %v427_v13 = vsel %vm406_vm2, %v417_v4, %v426_v12 }
  0x47   :  { %741 = vmatpush3.bf16.msra.mxu0 %v808_v43  ;;  %p878_p5 = por %p877_p4, %p876_p3 }
  0x48   :  { %719 = vmatmul.mubr.msk.bf16.gmra.mrb[4].mxu1 %vm156_vm15, %v143_v42  ;;  %770 = vmatprep.subr.bf16.mxu0 %v903_v0 }
  0x49   :  { %726 = vmatprep.mubr.msk.bf16.mxu1 %vm905_vm4, %v903_v0  ;;  %p879_p6 = pnand %p878_p5, %p872_p2 }
  0x4a   :  { %743 = vmatmul.mubr.msk.bf16.vlgmr.msra.gmra.mrb[4].mxu0 %vm156_vm15, %v312_v46 }
  0x4b   :  { %771 = vmatpush3.bf16.msra.mxu0 %v811_v47  ;;  %746 = vmatprep.mubr.msk.bf16.mxu0 %vm905_vm4, %v903_v0 }
  0x4c   :  { %772 = vmatprep.subr.bf16.mxu0 %v903_v0 }
  0x4f   :  { %773 = vmatpush3.bf16.msra.mxu0 %v813_v49 }
  0x50   :  { %727 = vmatmul.mubr.msk.bf16.vlgmr.msra.gmra.mrb[8].mxu1 %vm156_vm15, %v648_v26 }
  0x51   :  { %755 = vmatpush3.bf16.msra.mxu1 %v810_v50  ;;  %730 = vmatprep.mubr.msk.bf16.mxu1 %vm905_vm4, %v903_v0 }
  0x52   :  { %756 = vmatprep.subr.bf16.mxu1 %v903_v0  ;;  %747 = vmatmul.mubr.msk.bf16.gmra.mrb[8].mxu0 %vm156_vm15, %v314_v51 }
  0x53   :  { %750 = vmatprep.mubr.msk.bf16.mxu0 %vm905_vm4, %v903_v0 }
  0x55   :  { %757 = vmatpush3.bf16.msra.mxu1 %v812_v52 }
  0x58   :  { %731 = vmatmul.mubr.msk.bf16.gmra.mrb[12].mxu1 %vm156_vm15, %v977_v20 }
  0x59   :  { %734 = vmatprep.mubr.msk.bf16.mxu1 %vm905_vm4, %v903_v0 }
  0x5a   :  { %751 = vmatmul.mubr.msk.bf16.gmra.mrb[12].mxu0 %vm156_vm15, %v313_v48 }
  0x5b   :  { %774 = vmatprep.mubr.msk.bf16.mxu0 %vm905_vm4, %v903_v0 }
  0x60   :  { %735 = vmatmul.mubr.msk.bf16.gmra.mrb[16].mxu1 %vm156_vm15, %v814_v57 }
  0x61   :  { %758 = vmatprep.mubr.msk.bf16.mxu1 %vm905_vm4, %v903_v0 }
  0x62   :  { %775 = vmatmul.mubr.msk.bf16.vlgmr.msra.gmra.mrb[16].mxu0 %vm156_vm15, %v522_v2 }
  0x63   :  { %778 = vmatprep.mubr.msk.bf16.mxu0 %vm905_vm4, %v903_v0 }
  0x68   :  { %759 = vmatmul.mubr.msk.bf16.vlgmr.msra.gmra.mrb[20].mxu1 %vm156_vm15, %v418_v8 }
  0x69   :  { %762 = vmatprep.mubr.msk.bf16.mxu1 %vm905_vm4, %v903_v0 }
  0x6a   :  { %779 = vmatmul.mubr.msk.bf16.gmra.mrb[20].mxu0 %vm156_vm15, %v524_v11 }
  0x6b   :  { %782 = vmatprep.mubr.msk.bf16.mxu0 %vm905_vm4, %v903_v0 }
  0x70   :  { %763 = vmatmul.mubr.msk.bf16.gmra.mrb[24].mxu1 %vm156_vm15, %v427_v13 }
  0x71   :  { %766 = vmatprep.mubr.msk.bf16.mxu1 %vm905_vm4, %v903_v0 }
  0x72   :  { %783 = vmatmul.mubr.msk.bf16.gmra.mrb[24].mxu0 %vm156_vm15, %v523_v7 }
  0x78   :  { %767 = vmatmul.mubr.msk.bf16.gmra.mrb[28].mxu1 %vm156_vm15, %v426_v12 }
 0x113   :  { %v208_v14 = vpop.f32.mrb[0].mxu1 }
 0x114   :  { %v716_v15 = vpop.f32.mrb[1].mxu1 }
 0x115   :  { %v211_v16 = vpop.f32.mrb[2].mxu1  ;;  %v200_v18 = vpop.f32.mrb[0].mxu0 }
 0x116   :  { %v717_v17 = vpop.f32.mrb[3].mxu1  ;;  %v712_v19 = vpop.f32.mrb[1].mxu0 }
 0x117   :  { %v203_v20 = vpop.f32.mrb[2].mxu0 }
 0x118   :  { %v713_v21 = vpop.f32.mrb[3].mxu0 }
 0x11b   :  { %v216_v22 = vpop.f32.mrb[4].mxu1 }
 0x11c   :  { %v720_v23 = vpop.f32.mrb[5].mxu1 }
 0x11d   :  { %v219_v24 = vpop.f32.mrb[6].mxu1  ;;  %v370_v26 = vpop.f32.mrb[4].mxu0 }
 0x11e   :  { %v721_v25 = vpop.f32.mrb[7].mxu1  ;;  %v744_v27 = vpop.f32.mrb[5].mxu0 }
 0x11f   :  { %v373_v28 = vpop.f32.mrb[6].mxu0 }
 0x120   :  { %v745_v0 = vpop.f32.mrb[7].mxu0 }
 0x123   :  { %v278_v29 = vpop.f32.mrb[8].mxu1 }
 0x124   :  { %v279_v30 = vadd.f32 %v278_v29, %v200_v18  ;;  %v728_v31 = vpop.f32.mrb[9].mxu1 }
 0x125   :  { %v281_v32 = vpop.f32.mrb[10].mxu1  ;;  %v378_v35 = vpop.f32.mrb[8].mxu0 }
 0x126   :  { %v282_v33 = vadd.f32 %v281_v32, %v203_v20  ;;  %v729_v34 = vpop.f32.mrb[11].mxu1  ;;  %v392_v36 = vadd.f32 %v370_v26, %v279_v30  ;;  %v748_v37 = vpop.f32.mrb[9].mxu0 }
 0x127   :  { %v381_v38 = vpop.f32.mrb[10].mxu0 }
 0x128   :  { %v393_v39 = vadd.f32 %v373_v28, %v282_v33  ;;  %v749_v40 = vpop.f32.mrb[11].mxu0 }
 0x12b   :  { %v286_v41 = vpop.f32.mrb[12].mxu1 }
 0x12c   :  { %v287_v42 = vadd.f32 %v286_v41, %v208_v14  ;;  %v732_v43 = vpop.f32.mrb[13].mxu1 }
 0x12d   :  { %v289_v44 = vpop.f32.mrb[14].mxu1  ;;  %v386_v47 = vpop.f32.mrb[12].mxu0 }
 0x12e   :  { %v290_v45 = vadd.f32 %v289_v44, %v211_v16  ;;  %v733_v46 = vpop.f32.mrb[15].mxu1  ;;  %v394_v48 = vadd.f32 %v378_v35, %v287_v42  ;;  %v752_v49 = vpop.f32.mrb[13].mxu0 }
 0x12f   :  { %v389_v50 = vpop.f32.mrb[14].mxu0 }
 0x130   :  { %v395_v51 = vadd.f32 %v381_v38, %v290_v45  ;;  %v753_v52 = vpop.f32.mrb[15].mxu0 }
 0x133   :  { %v294_v53 = vpop.f32.mrb[16].mxu1 }
 0x134   :  { %v295_v54 = vadd.f32 %v294_v53, %v216_v22  ;;  %v736_v55 = vpop.f32.mrb[17].mxu1 }
 0x135   :  { %v297_v56 = vpop.f32.mrb[18].mxu1  ;;  %v580_v58 = vpop.f32.mrb[16].mxu0 }
 0x136   :  { %v737_v57 = vpop.f32.mrb[19].mxu1  ;;  %v396_v59 = vadd.f32 %v386_v47, %v295_v54  ;;  %v776_v60 = vpop.f32.mrb[17].mxu0 }
 0x137   :  { %v583_v61 = vpop.f32.mrb[18].mxu0 }
 0x138   :  { %v777_v62 = vpop.f32.mrb[19].mxu0 }
 0x13b   :  { %v483_v63 = vpop.f32.mrb[20].mxu1 }
 0x13c   :  { %v505_v1 = vadd.f32 %v483_v63, %v392_v36  ;;  %v760_v2 = vpop.f32.mrb[21].mxu1 }
 0x13d   :  { %v486_v4 = vpop.f32.mrb[22].mxu1  ;;  %v588_v8 = vpop.f32.mrb[20].mxu0 }
 0x13e   :  { %v602_v5 = vadd.f32 %v580_v58, %v505_v1  ;;  %v506_v6 = vadd.f32 %v486_v4, %v393_v39  ;;  %v761_v7 = vpop.f32.mrb[23].mxu1  ;;  %v780_v9 = vpop.f32.mrb[21].mxu0 }
 0x13f   :  { %v591_v12 = vpop.f32.mrb[22].mxu0 }
 0x140   :  { %v614_v10 = vadd.f32 %v680_v3, %v602_v5  ;;  %v603_v11 = vadd.f32 %v583_v61, %v506_v6  ;;  %v781_v13 = vpop.f32.mrb[23].mxu0 }
 0x142   :  { %817 = vtanh.f32 %v614_v10  ;;  %v615_v14 = vadd.f32 %v680_v3, %v603_v11 }
 0x143   :  { %v491_v15 = vpop.f32.mrb[24].mxu1 }
 0x144   :  { %819 = vtanh.f32 %v615_v14  ;;  %v507_v16 = vadd.f32 %v491_v15, %v394_v48  ;;  %v764_v17 = vpop.f32.mrb[25].mxu1 }
 0x145   :  { %v494_v18 = vpop.f32.mrb[26].mxu1  ;;  %v596_v22 = vpop.f32.mrb[24].mxu0 }
 0x146   :  { %v604_v19 = vadd.f32 %v588_v8, %v507_v16  ;;  %v508_v20 = vadd.f32 %v494_v18, %v395_v51  ;;  %v765_v21 = vpop.f32.mrb[27].mxu1  ;;  %v784_v23 = vpop.f32.mrb[25].mxu0 }
 0x147   :  { %v599_v26 = vpop.f32.mrb[26].mxu0 }
 0x148   :  { %v616_v24 = vadd.f32 %v680_v3, %v604_v19  ;;  %v605_v25 = vadd.f32 %v591_v12, %v508_v20  ;;  %v785_v27 = vpop.f32.mrb[27].mxu0 }
 0x14a   :  { %821 = vtanh.f32 %v616_v24  ;;  %v617_v28 = vadd.f32 %v680_v3, %v605_v25 }
 0x14b   :  { %v499_v0 = vpop.f32.mrb[28].mxu1 }
 0x14c   :  { %v818_v29 = vpop.eup %817  ;;  %823 = vtanh.f32 %v617_v28  ;;  %v509_v30 = vadd.f32 %v499_v0, %v396_v59  ;;  %v768_v31 = vpop.f32.mrb[29].mxu1 }
 0x14d   :  { %624 = vst [vmem:[#allocation8] sm:$0xff] %v818_v29  ;;  %v502_v32 = vpop.f32.mrb[30].mxu1 }
 0x14e   :  { %v820_v33 = vpop.eup %819  ;;  %v606_v34 = vadd.f32 %v596_v22, %v509_v30  ;;  %v769_v35 = vpop.f32.mrb[31].mxu1 }
 0x14f   :  { %625 = vst [vmem:[#allocation8 + $0x8] sm:$0xff] %v820_v33 }
 0x150   :  { %v618_v36 = vadd.f32 %v680_v3, %v606_v34 }
 0x152   :  { %825 = vtanh.f32 %v618_v36 }
 0x154   :  { %v822_v37 = vpop.eup %821 }
 0x155   :  { %627 = vst [vmem:[#allocation8 + $0xc] sm:$0xf0] %v822_v37 }
 0x156   :  { %v824_v38 = vpop.eup %823 }
 0x157   :  { %628 = vst [vmem:[#allocation8 + $0x14] sm:$0xff] %v824_v38 }
 0x15c   :  { %v826_v39 = vpop.eup %825 }
 0x15d   :  { %629 = vst [vmem:[#allocation8 + $0x1c] sm:$0xf] %v826_v39 }
 0x15e   :  { %882 = shalt.err (!%p879_p6)
}
 0x15f   :  { %s883_s15 = scalar_lea.hbm %s1073_s3, 512 }
 0x160   :  { %p884_p7 = scmp.ne.s32.totalorder %s1073_s3, %s883_s15  ;;  %p887_p8 = scmp.lt.u32.totalorder %s883_s15, %s1073_s3 }
 0x162   :  { %p889_p9 = pnand %p887_p8, %p884_p7 }
 0x164   :  { %892 = shalt.err (!%p889_p9)
}
 0x165   :  { %s907_s20 = smov 128   ;;  %s908_s21 = smov 8  }
 0x166   :  { %641 = dma.vmem_to_hbm [thread:$0]  %s636_s11, 512, %s1073_s3, [#allocation5], %s907_s20, %s907_s20, %s908_s21  }
 0x167   :  { %897 = dma.done.wait [#allocation5], 512  }
 0x168   :  { %898 = vsyncadd [#allocation5], 4294966784 }
 0x169   :  { %645 = vsyncpa [#allocation4], 1 }
 0x16a   :  { %646 = vsyncpa [#allocation7], 1 }
 0x16b   :  { %647 = vsyncpa [#allocation5], 1 }

</bundles_post_ra>
